<compile_context>
chip_gen: v5e
topology: v5e:2x2
jax: 0.10.0
libtpu: 0.0.40
codegen_flags: <defaults>
</compile_context>

<pallas_src>
import jax
import jax.numpy as jnp
from jax import lax
from jax.experimental import pallas as pl
from jax.experimental.pallas import tpu as pltpu

LANES = 128  # lane-dense padded width for the tiny 2-class head


def rnn_recurrence_kernel(xproj_ref, whh_ref, wout_ref, bout_ref, out_ref):
    # xproj_ref : (seq_len, tb, hidden)  precomputed  emb[idx] @ W_ih^T + b_ih + b_hh
    # whh_ref   : (hidden, hidden)       W_hh^T  (row-major (B,K)@(K,N))
    # wout_ref  : (hidden, LANES)        W_out^T zero-padded to 128 lanes
    # bout_ref  : (1, LANES)             b_out zero-padded
    # out_ref   : (tb, LANES)
    seq_len = xproj_ref.shape[0]
    tb = out_ref.shape[0]
    hidden = whh_ref.shape[0]

    # Hoist the recurrent weight load out of the loop (loaded once, lives in vregs).
    whh = whh_ref[...]

    # h_0 = 0 (PyTorch default when no initial hidden state is given); carried in registers.
    h0 = jnp.zeros((tb, hidden), jnp.float32)

    def step(t, h):
        # Single matmul + tanh on the serial dependence chain; input projection & bias
        # were hoisted into x_proj, so there is no per-step broadcast or second matmul.
        return jnp.tanh(
            xproj_ref[t]
            + jnp.dot(h, whh, preferred_element_type=jnp.float32))

    h_last = lax.fori_loop(0, seq_len, step, h0, unroll=True)

    # x = relu(h_T) ; logits = x @ W_out^T + b_out   (lane-dense 128-wide store)
    h_relu = jnp.maximum(h_last, 0.0)
    out_ref[...] = (jnp.dot(h_relu, wout_ref[...], preferred_element_type=jnp.float32)
                    + bout_ref[...])


def rnn_text_classifier(x_idx, embeddings, w_ih, w_hh, b_ih, b_hh, w_out, b_out):
    """x_idx: (seq_len, batch) int32 token indices (time-major, torch.nn.RNN default)."""
    seq_len, batch = x_idx.shape
    hidden = w_hh.shape[0]
    n_out = w_out.shape[0]

    # Fold frozen embedding + input projection + both biases into one (vocab, hidden) table.
    # Forward of nn.Embedding.from_pretrained(..., padding_idx=...) is a plain lookup, so
    # this is exact. The per-token input projection then becomes a gather (JAX glue).
    proj_table = (embeddings @ w_ih.T + (b_ih + b_hh)).astype(jnp.float32)
    x_proj = jnp.take(proj_table, x_idx, axis=0)           # (seq_len, batch, hidden)

    whh_t = w_hh.T.astype(jnp.float32)                      # (hidden, hidden)

    # Lane-dense output head: zero-pad 2 -> 128 columns, slice afterwards.
    wout_pad = jnp.zeros((hidden, LANES), jnp.float32).at[:, :n_out].set(w_out.T)
    bout_pad = jnp.zeros((1, LANES), jnp.float32).at[:, :n_out].set(b_out)

    # Batch tiling: pad to a multiple of 8 sublanes; tile up to 128 rows per grid step so
    # large batches shard across cores via the "parallel" grid axis.
    padded_batch = ((batch + 7) // 8) * 8
    if padded_batch != batch:
        x_proj = jnp.pad(x_proj, ((0, 0), (0, padded_batch - batch), (0, 0)))
    tb = min(padded_batch, 128)
    while padded_batch % tb:
        tb -= 8
    grid = (padded_batch // tb,)

    out_pad = pl.pallas_call(
        rnn_recurrence_kernel,
        out_shape=jax.ShapeDtypeStruct((padded_batch, LANES), jnp.float32),
        grid_spec=pltpu.PrefetchScalarGridSpec(
            num_scalar_prefetch=0,
            grid=grid,
            in_specs=[
                pl.BlockSpec((seq_len, tb, hidden), lambda b: (0, b, 0)),
                pl.BlockSpec((hidden, hidden), lambda b: (0, 0)),
                pl.BlockSpec((hidden, LANES), lambda b: (0, 0)),
                pl.BlockSpec((1, LANES), lambda b: (0, 0)),
            ],
            out_specs=pl.BlockSpec((tb, LANES), lambda b: (b, 0)),
        ),
        compiler_params=pltpu.CompilerParams(
            dimension_semantics=("parallel",)),
    )(x_proj, whh_t, wout_pad, bout_pad)

    return out_pad[:batch, :n_out]


def reference_forward(x_idx, embeddings, w_ih, w_hh, b_ih, b_hh, w_out, b_out):
    """Pure-JAX reference mirroring the torch module's forward."""
    x_emb = jnp.take(embeddings, x_idx, axis=0)             # (seq, batch, embed)
    batch = x_emb.shape[1]
    hidden = w_hh.shape[0]
    h = jnp.zeros((batch, hidden), jnp.float32)

    def step(h, x_t):
        h_new = jnp.tanh(x_t @ w_ih.T + b_ih + h @ w_hh.T + b_hh)
        return h_new, None

    h_last, _ = lax.scan(step, h, x_emb)
    x = jnp.maximum(h_last, 0.0)
    return x @ w_out.T + b_out


if __name__ == "__main__":
    # Small, deterministic setup.
    vocab, embed_dim, hidden = 16, 32, 128
    seq_len, batch = 8, 8

    key = jax.random.PRNGKey(0)
    k_emb, k_ih, k_hh, k_bih, k_bhh, k_wout, k_bout, k_x = jax.random.split(key, 8)

    embeddings = jax.random.normal(k_emb, (vocab, embed_dim), jnp.float32)

    # torch.nn.RNN / Linear default init: uniform(-1/sqrt(hidden), 1/sqrt(hidden))
    bound = 1.0 / jnp.sqrt(jnp.float32(hidden))
    w_ih = jax.random.uniform(k_ih, (hidden, embed_dim), jnp.float32, -bound, bound)
    w_hh = jax.random.uniform(k_hh, (hidden, hidden), jnp.float32, -bound, bound)
    b_ih = jax.random.uniform(k_bih, (hidden,), jnp.float32, -bound, bound)
    b_hh = jax.random.uniform(k_bhh, (hidden,), jnp.float32, -bound, bound)
    w_out = jax.random.uniform(k_wout, (2, hidden), jnp.float32, -bound, bound)
    b_out = jax.random.uniform(k_bout, (2,), jnp.float32, -bound, bound)

    x_idx = jax.random.randint(k_x, (seq_len, batch), 0, vocab, jnp.int32)

    out = rnn_text_classifier(x_idx, embeddings, w_ih, w_hh, b_ih, b_hh, w_out, b_out)
    out = jax.block_until_ready(out)

    ref = reference_forward(x_idx, embeddings, w_ih, w_hh, b_ih, b_hh, w_out, b_out)
    assert out.shape == (batch, 2), out.shape
    assert jnp.allclose(out, ref, atol=1e-4, rtol=1e-4), (out, ref)

    print("KERNEL_OK")
</pallas_src>

<mosaic_0001>
module attributes {stable_mosaic.version = 11 : i64} {
  func.func @rnn_recurrence_kernel(%arg0: i32, %arg1: memref<8x8x128xf32, #tpu.memory_space<vmem>>, %arg2: memref<128x128xf32, #tpu.memory_space<vmem>>, %arg3: memref<128x128xf32, #tpu.memory_space<vmem>>, %arg4: memref<1x128xf32, #tpu.memory_space<vmem>>, %arg5: memref<8x128xf32, #tpu.memory_space<vmem>>) attributes {dimension_semantics = [#tpu.dimension_semantics<parallel>], iteration_bounds = array<i64: 1>, scalar_prefetch = 0 : i64, scratch_operands = 0 : i64, tpu.core_type = #tpu.core_type<tc>, window_params = [{transform_indices = @transform_0, window_bounds = array<i64: 8, 8, 128>}, {pipeline_mode = #tpu.pipeline_mode<synchronous>, transform_indices = @transform_1, window_bounds = array<i64: 128, 128>}, {pipeline_mode = #tpu.pipeline_mode<synchronous>, transform_indices = @transform_2, window_bounds = array<i64: 128, 128>}, {pipeline_mode = #tpu.pipeline_mode<synchronous>, transform_indices = @transform_3, window_bounds = array<i64: 1, 128>}, {transform_indices = @transform_4, window_bounds = array<i64: 8, 128>}]} {
    %c0 = arith.constant 0 : index
    %c0_0 = arith.constant 0 : index
    %0 = vector.load %arg2[%c0, %c0_0] : memref<128x128xf32, #tpu.memory_space<vmem>>, vector<128x128xf32>
    %cst = arith.constant 0.000000e+00 : f32
    %1 = vector.broadcast %cst : f32 to vector<8x128xf32>
    %c0_i32 = arith.constant 0 : i32
    %2 = arith.index_cast %c0_i32 : i32 to index
    %c0_1 = arith.constant 0 : index
    %c0_2 = arith.constant 0 : index
    %3 = vector.load %arg1[%2, %c0_1, %c0_2] : memref<8x8x128xf32, #tpu.memory_space<vmem>>, vector<1x8x128xf32>
    %4 = vector.shape_cast %3 : vector<1x8x128xf32> to vector<8x128xf32>
    %cst_3 = arith.constant dense<0.000000e+00> : vector<8x128xf32>
    %5 = tpu.matmul %1, %0, %cst_3 {dimension_numbers = #tpu.dot_dimension_numbers<[1], [0], [0], [1], [0, 0, 1, 1], [], []>} : vector<8x128xf32>, vector<128x128xf32>, vector<8x128xf32> -> vector<8x128xf32>
    %6 = arith.addf %4, %5 : vector<8x128xf32>
    %7 = math.tanh %6 : vector<8x128xf32>
    %c1_i32 = arith.constant 1 : i32
    %8 = arith.index_cast %c1_i32 : i32 to index
    %c0_4 = arith.constant 0 : index
    %c0_5 = arith.constant 0 : index
    %9 = vector.load %arg1[%8, %c0_4, %c0_5] : memref<8x8x128xf32, #tpu.memory_space<vmem>>, vector<1x8x128xf32>
    %10 = vector.shape_cast %9 : vector<1x8x128xf32> to vector<8x128xf32>
    %cst_6 = arith.constant dense<0.000000e+00> : vector<8x128xf32>
    %11 = tpu.matmul %7, %0, %cst_6 {dimension_numbers = #tpu.dot_dimension_numbers<[1], [0], [0], [1], [0, 0, 1, 1], [], []>} : vector<8x128xf32>, vector<128x128xf32>, vector<8x128xf32> -> vector<8x128xf32>
    %12 = arith.addf %10, %11 : vector<8x128xf32>
    %13 = math.tanh %12 : vector<8x128xf32>
    %c2_i32 = arith.constant 2 : i32
    %14 = arith.index_cast %c2_i32 : i32 to index
    %c0_7 = arith.constant 0 : index
    %c0_8 = arith.constant 0 : index
    %15 = vector.load %arg1[%14, %c0_7, %c0_8] : memref<8x8x128xf32, #tpu.memory_space<vmem>>, vector<1x8x128xf32>
    %16 = vector.shape_cast %15 : vector<1x8x128xf32> to vector<8x128xf32>
    %cst_9 = arith.constant dense<0.000000e+00> : vector<8x128xf32>
    %17 = tpu.matmul %13, %0, %cst_9 {dimension_numbers = #tpu.dot_dimension_numbers<[1], [0], [0], [1], [0, 0, 1, 1], [], []>} : vector<8x128xf32>, vector<128x128xf32>, vector<8x128xf32> -> vector<8x128xf32>
    %18 = arith.addf %16, %17 : vector<8x128xf32>
    %19 = math.tanh %18 : vector<8x128xf32>
    %c3_i32 = arith.constant 3 : i32
    %20 = arith.index_cast %c3_i32 : i32 to index
    %c0_10 = arith.constant 0 : index
    %c0_11 = arith.constant 0 : index
    %21 = vector.load %arg1[%20, %c0_10, %c0_11] : memref<8x8x128xf32, #tpu.memory_space<vmem>>, vector<1x8x128xf32>
    %22 = vector.shape_cast %21 : vector<1x8x128xf32> to vector<8x128xf32>
    %cst_12 = arith.constant dense<0.000000e+00> : vector<8x128xf32>
    %23 = tpu.matmul %19, %0, %cst_12 {dimension_numbers = #tpu.dot_dimension_numbers<[1], [0], [0], [1], [0, 0, 1, 1], [], []>} : vector<8x128xf32>, vector<128x128xf32>, vector<8x128xf32> -> vector<8x128xf32>
    %24 = arith.addf %22, %23 : vector<8x128xf32>
    %25 = math.tanh %24 : vector<8x128xf32>
    %c4_i32 = arith.constant 4 : i32
    %26 = arith.index_cast %c4_i32 : i32 to index
    %c0_13 = arith.constant 0 : index
    %c0_14 = arith.constant 0 : index
    %27 = vector.load %arg1[%26, %c0_13, %c0_14] : memref<8x8x128xf32, #tpu.memory_space<vmem>>, vector<1x8x128xf32>
    %28 = vector.shape_cast %27 : vector<1x8x128xf32> to vector<8x128xf32>
    %cst_15 = arith.constant dense<0.000000e+00> : vector<8x128xf32>
    %29 = tpu.matmul %25, %0, %cst_15 {dimension_numbers = #tpu.dot_dimension_numbers<[1], [0], [0], [1], [0, 0, 1, 1], [], []>} : vector<8x128xf32>, vector<128x128xf32>, vector<8x128xf32> -> vector<8x128xf32>
    %30 = arith.addf %28, %29 : vector<8x128xf32>
    %31 = math.tanh %30 : vector<8x128xf32>
    %c5_i32 = arith.constant 5 : i32
    %32 = arith.index_cast %c5_i32 : i32 to index
    %c0_16 = arith.constant 0 : index
    %c0_17 = arith.constant 0 : index
    %33 = vector.load %arg1[%32, %c0_16, %c0_17] : memref<8x8x128xf32, #tpu.memory_space<vmem>>, vector<1x8x128xf32>
    %34 = vector.shape_cast %33 : vector<1x8x128xf32> to vector<8x128xf32>
    %cst_18 = arith.constant dense<0.000000e+00> : vector<8x128xf32>
    %35 = tpu.matmul %31, %0, %cst_18 {dimension_numbers = #tpu.dot_dimension_numbers<[1], [0], [0], [1], [0, 0, 1, 1], [], []>} : vector<8x128xf32>, vector<128x128xf32>, vector<8x128xf32> -> vector<8x128xf32>
    %36 = arith.addf %34, %35 : vector<8x128xf32>
    %37 = math.tanh %36 : vector<8x128xf32>
    %c6_i32 = arith.constant 6 : i32
    %38 = arith.index_cast %c6_i32 : i32 to index
    %c0_19 = arith.constant 0 : index
    %c0_20 = arith.constant 0 : index
    %39 = vector.load %arg1[%38, %c0_19, %c0_20] : memref<8x8x128xf32, #tpu.memory_space<vmem>>, vector<1x8x128xf32>
    %40 = vector.shape_cast %39 : vector<1x8x128xf32> to vector<8x128xf32>
    %cst_21 = arith.constant dense<0.000000e+00> : vector<8x128xf32>
    %41 = tpu.matmul %37, %0, %cst_21 {dimension_numbers = #tpu.dot_dimension_numbers<[1], [0], [0], [1], [0, 0, 1, 1], [], []>} : vector<8x128xf32>, vector<128x128xf32>, vector<8x128xf32> -> vector<8x128xf32>
    %42 = arith.addf %40, %41 : vector<8x128xf32>
    %43 = math.tanh %42 : vector<8x128xf32>
    %c7_i32 = arith.constant 7 : i32
    %44 = arith.index_cast %c7_i32 : i32 to index
    %c0_22 = arith.constant 0 : index
    %c0_23 = arith.constant 0 : index
    %45 = vector.load %arg1[%44, %c0_22, %c0_23] : memref<8x8x128xf32, #tpu.memory_space<vmem>>, vector<1x8x128xf32>
    %46 = vector.shape_cast %45 : vector<1x8x128xf32> to vector<8x128xf32>
    %cst_24 = arith.constant dense<0.000000e+00> : vector<8x128xf32>
    %47 = tpu.matmul %43, %0, %cst_24 {dimension_numbers = #tpu.dot_dimension_numbers<[1], [0], [0], [1], [0, 0, 1, 1], [], []>} : vector<8x128xf32>, vector<128x128xf32>, vector<8x128xf32> -> vector<8x128xf32>
    %48 = arith.addf %46, %47 : vector<8x128xf32>
    %49 = math.tanh %48 : vector<8x128xf32>
    %c8_i32 = arith.constant 8 : i32
    %cst_25 = arith.constant 0.000000e+00 : f32
    %50 = vector.broadcast %cst_25 : f32 to vector<8x128xf32>
    %51 = arith.maximumf %49, %50 : vector<8x128xf32>
    %c0_26 = arith.constant 0 : index
    %c0_27 = arith.constant 0 : index
    %52 = vector.load %arg3[%c0_26, %c0_27] : memref<128x128xf32, #tpu.memory_space<vmem>>, vector<128x128xf32>
    %cst_28 = arith.constant dense<0.000000e+00> : vector<8x128xf32>
    %53 = tpu.matmul %51, %52, %cst_28 {dimension_numbers = #tpu.dot_dimension_numbers<[1], [0], [0], [1], [0, 0, 1, 1], [], []>} : vector<8x128xf32>, vector<128x128xf32>, vector<8x128xf32> -> vector<8x128xf32>
    %c0_29 = arith.constant 0 : index
    %c0_30 = arith.constant 0 : index
    %54 = vector.load %arg4[%c0_29, %c0_30] : memref<1x128xf32, #tpu.memory_space<vmem>>, vector<1x128xf32>
    %55 = vector.broadcast %54 : vector<1x128xf32> to vector<8x128xf32>
    %56 = arith.addf %53, %55 : vector<8x128xf32>
    %c0_31 = arith.constant 0 : index
    %c0_32 = arith.constant 0 : index
    %57 = vector.load %arg5[%c0_31, %c0_32] : memref<8x128xf32, #tpu.memory_space<vmem>>, vector<8x128xf32>
    tpu.vector_store %arg5[%c0_31, %c0_32], %56 {strides = array<i32>} : memref<8x128xf32, #tpu.memory_space<vmem>>, vector<8x128xf32>,
    return
  }
  func.func @transform_0(%arg0: i32) -> (i32, i32, i32) {
    %c0_i32 = arith.constant 0 : i32
    %c0_i32_0 = arith.constant 0 : i32
    %c0_i32_1 = arith.constant 0 : i32
    return %c0_i32, %arg0, %c0_i32_0 : i32, i32, i32
  }
  func.func @transform_1(%arg0: i32) -> (i32, i32) {
    %c0_i32 = arith.constant 0 : i32
    %c0_i32_0 = arith.constant 0 : i32
    %c0_i32_1 = arith.constant 0 : i32
    return %c0_i32, %c0_i32_0 : i32, i32
  }
  func.func @transform_2(%arg0: i32) -> (i32, i32) {
    %c0_i32 = arith.constant 0 : i32
    %c0_i32_0 = arith.constant 0 : i32
    %c0_i32_1 = arith.constant 0 : i32
    return %c0_i32, %c0_i32_0 : i32, i32
  }
  func.func @transform_3(%arg0: i32) -> (i32, i32) {
    %c0_i32 = arith.constant 0 : i32
    %c0_i32_0 = arith.constant 0 : i32
    %c0_i32_1 = arith.constant 0 : i32
    return %c0_i32, %c0_i32_0 : i32, i32
  }
  func.func @transform_4(%arg0: i32) -> (i32, i32) {
    %c0_i32 = arith.constant 0 : i32
    %c0_i32_0 = arith.constant 0 : i32
    return %arg0, %c0_i32 : i32, i32
  }
}

</mosaic_0001>

<bundles_post_ra>
// kernel: tpu_custom_call.1
= control target key start
LH: loop header
LB: loop body
LE: loop exit
PB: predicated region body
PF: predicated region fallthrough
CT: control target
= control target key end

     0   :  { %9 = vsyncpa [#allocation3], 0  ;;  %s665_s0 = inlined_call_operand.hbm [shape: f32[8,8,128], index: 0, kind: input, shape index: {}]   ;;  %s666_s1 = inlined_call_operand.hbm [shape: f32[128,128], index: 1, kind: input, shape index: {}]   ;;  %s667_s2 = inlined_call_operand.hbm [shape: f32[128,128], index: 2, kind: input, shape index: {}]   ;;  %s668_s3 = inlined_call_operand.vmem [shape: f32[1,128], index: 3, kind: input, shape index: {}]   ;;  %s669_s4 = inlined_call_operand.hbm [shape: f32[8,128], index: 4, kind: output, shape index: {}]  }
   0x1   :  { %10 = vsyncpa [#allocation6], 0 }
   0x2   :  { %11 = vsyncpa [#allocation4], 0  ;;  %s29_s17 = sshll.u32 %s666_s1, 4  ;;  %s458_s18 = smov [#allocation5]   ;;  %s30_s17 = int_to_ptr.hbm [resolvable:$true] %s29_s17 }
   0x3   :  { %s31_s19 = sshll.u32 %s458_s18, 4  ;;  %s16_s22 = sshll.u32 %s665_s0, 4  ;;  %s32_s19 = int_to_ptr.vmem [resolvable:$true] %s31_s19  ;;  %s17_s22 = int_to_ptr.hbm [resolvable:$true] %s16_s22 }
   0x4   :  { %s459_s23 = smov 128   ;;  %s460_s24 = smov 8  }
   0x5   :  { %37 = dma.hbm_to_vmem [thread:$0]  %s30_s17, 2048, %s32_s19, [#allocation6], %s459_s23, %s459_s23, %s460_s24  }
   0x6   :  { %s461_s25 = smov [#allocation2]   ;;  %s42_s29 = sshll.u32 %s667_s2, 4  ;;  %s43_s29 = int_to_ptr.hbm [resolvable:$true] %s42_s29 }
   0x7   :  { %s18_s26 = sshll.u32 %s461_s25, 4  ;;  %s462_s1 = smov [#allocation7]   ;;  %s19_s26 = int_to_ptr.vmem [resolvable:$true] %s18_s26 }
   0x8   :  { %24 = dma.hbm_to_vmem [thread:$0]  %s17_s22, 1024, %s19_s26, [#allocation3], %s459_s23, %s459_s23, %s460_s24  }
   0x9   :  { %s44_s30 = sshll.u32 %s462_s1, 4  ;;  %s45_s30 = int_to_ptr.vmem [resolvable:$true] %s44_s30 }
   0xa   :  { %50 = dma.hbm_to_vmem [thread:$0]  %s43_s29, 2048, %s45_s30, [#allocation6], %s459_s23, %s459_s23, %s460_s24  }
   0xb   :  { %452 = dma.done.wait [#allocation3], 1024  }
   0xc   :  { %453 = vsyncadd [#allocation3], 4294966272 }
   0xd   :  { %454 = dma.done.wait [#allocation6], 4096  }
   0xe   :  { %455 = vsyncadd [#allocation6], 4294963200  ;;  %v499_v0 = vld [vmem:[#allocation5 + $0x78] sm:$0xff]  ;;  %v501_v1 = vld [vmem:[#allocation5 + $0x70] sm:$0xff]  ;;  %v463_v16 = vmov 0.0   ;;  %s464_s5 = smov [#allocation8]  }
   0xf   :  { %82 = vmatpush.msra.mxu0 %v499_v0  ;;  %106 = vmatpush.msra.mxu1 %v499_v0  ;;  %v505_v2 = vld [vmem:[#allocation5 + $0x68] sm:$0xff]  ;;  %v511_v3 = vld [vmem:[#allocation5 + $0x60] sm:$0xff]  ;;  %v517_v4 = vld [vmem:[#allocation5 + $0x58] sm:$0xff]  ;;  %s319_s6 = sshll.u32 %s464_s5, 4  ;;  %s321_s9 = sshll.u32 %s669_s4, 4  ;;  %s320_s6 = int_to_ptr.vmem [resolvable:$true] %s319_s6  ;;  %s322_s9 = int_to_ptr.hbm [resolvable:$true] %s321_s9 }
  0x10   :  { %130 = vmatpush.msra.mxu2 %v499_v0  ;;  %154 = vmatpush.msra.mxu3 %v499_v0  ;;  %v523_v5 = vld [vmem:[#allocation5 + $0x50] sm:$0xff]  ;;  %v529_v6 = vld [vmem:[#allocation5 + $0x48] sm:$0xff]  ;;  %v535_v7 = vld [vmem:[#allocation5 + $0x40] sm:$0xff] }
  0x11   :  { %83 = vmatpush.msra.mxu0 %v501_v1  ;;  %107 = vmatpush.msra.mxu1 %v501_v1  ;;  %v541_v8 = vld [vmem:[#allocation5 + $0x38] sm:$0xff]  ;;  %v547_v9 = vld [vmem:[#allocation5 + $0x30] sm:$0xff]  ;;  %v553_v10 = vld [vmem:[#allocation5 + $0x28] sm:$0xff] }
  0x12   :  { %131 = vmatpush.msra.mxu2 %v501_v1  ;;  %155 = vmatpush.msra.mxu3 %v501_v1  ;;  %v559_v11 = vld [vmem:[#allocation5 + $0x20] sm:$0xff]  ;;  %v565_v12 = vld [vmem:[#allocation5 + $0x18] sm:$0xff]  ;;  %v571_v13 = vld [vmem:[#allocation5 + $0x10] sm:$0xff] }
  0x13   :  { %84 = vmatpush.msra.mxu0 %v505_v2  ;;  %108 = vmatpush.msra.mxu1 %v505_v2  ;;  %v577_v14 = vld [vmem:[#allocation5 + $0x8] sm:$0xff]  ;;  %v583_v15 = vld [vmem:[#allocation5] sm:$0xff]  ;;  %v129_v25 = vld [vmem:[#allocation2 + $0x10] sm:$0xff] }
  0x14   :  { %132 = vmatpush.msra.mxu2 %v505_v2  ;;  %156 = vmatpush.msra.mxu3 %v505_v2  ;;  %v81_v17 = vld [vmem:[#allocation2] sm:$0xff]  ;;  %v105_v21 = vld [vmem:[#allocation2 + $0x8] sm:$0xff]  ;;  %v153_v29 = vld [vmem:[#allocation2 + $0x18] sm:$0xff] }
  0x15   :  { %85 = vmatpush.msra.mxu0 %v511_v3  ;;  %109 = vmatpush.msra.mxu1 %v511_v3  ;;  %v177_v33 = vld [vmem:[#allocation2 + $0x20] sm:$0xff]  ;;  %v201_v37 = vld [vmem:[#allocation2 + $0x28] sm:$0xff]  ;;  %v288_v41 = vld [vmem:[#allocation7 + $0x78] sm:$0xff] }
  0x16   :  { %133 = vmatpush.msra.mxu2 %v511_v3  ;;  %157 = vmatpush.msra.mxu3 %v511_v3  ;;  %v287_v42 = vld [vmem:[#allocation7 + $0x70] sm:$0xff]  ;;  %v286_v43 = vld [vmem:[#allocation7 + $0x68] sm:$0xff]  ;;  %v285_v44 = vld [vmem:[#allocation7 + $0x60] sm:$0xff] }
  0x17   :  { %86 = vmatpush.msra.mxu0 %v517_v4  ;;  %110 = vmatpush.msra.mxu1 %v517_v4  ;;  %v284_v45 = vld [vmem:[#allocation7 + $0x58] sm:$0xff]  ;;  %v283_v46 = vld [vmem:[#allocation7 + $0x50] sm:$0xff]  ;;  %v282_v47 = vld [vmem:[#allocation7 + $0x48] sm:$0xff] }
  0x18   :  { %134 = vmatpush.msra.mxu2 %v517_v4  ;;  %158 = vmatpush.msra.mxu3 %v517_v4  ;;  %v281_v48 = vld [vmem:[#allocation7 + $0x40] sm:$0xff]  ;;  %v280_v49 = vld [vmem:[#allocation7 + $0x38] sm:$0xff]  ;;  %v279_v50 = vld [vmem:[#allocation7 + $0x30] sm:$0xff] }
  0x19   :  { %87 = vmatpush.msra.mxu0 %v523_v5  ;;  %111 = vmatpush.msra.mxu1 %v523_v5  ;;  %v225_v51 = vld [vmem:[#allocation2 + $0x30] sm:$0xff]  ;;  %v278_v55 = vld [vmem:[#allocation7 + $0x28] sm:$0xff]  ;;  %v277_v56 = vld [vmem:[#allocation7 + $0x20] sm:$0xff] }
  0x1a   :  { %135 = vmatpush.msra.mxu2 %v523_v5  ;;  %159 = vmatpush.msra.mxu3 %v523_v5  ;;  %v276_v57 = vld [vmem:[#allocation7 + $0x18] sm:$0xff]  ;;  %v275_v58 = vld [vmem:[#allocation7 + $0x10] sm:$0xff]  ;;  %v274_v59 = vld [vmem:[#allocation7 + $0x8] sm:$0xff] }
  0x1b   :  { %88 = vmatpush.msra.mxu0 %v529_v6  ;;  %112 = vmatpush.msra.mxu1 %v529_v6  ;;  %v273_v60 = vld [vmem:[#allocation7] sm:$0xff]  ;;  %v249_v61 = vld [vmem:[#allocation2 + $0x38] sm:$0xff] }
  0x1c   :  { %136 = vmatpush.msra.mxu2 %v529_v6  ;;  %160 = vmatpush.msra.mxu3 %v529_v6 }
  0x1d   :  { %89 = vmatpush.msra.mxu0 %v535_v7  ;;  %113 = vmatpush.msra.mxu1 %v535_v7 }
  0x1e   :  { %137 = vmatpush.msra.mxu2 %v535_v7  ;;  %161 = vmatpush.msra.mxu3 %v535_v7 }
  0x1f   :  { %90 = vmatpush.msra.mxu0 %v541_v8  ;;  %114 = vmatpush.msra.mxu1 %v541_v8 }
  0x20   :  { %138 = vmatpush.msra.mxu2 %v541_v8  ;;  %162 = vmatpush.msra.mxu3 %v541_v8 }
  0x21   :  { %91 = vmatpush.msra.mxu0 %v547_v9  ;;  %115 = vmatpush.msra.mxu1 %v547_v9 }
  0x22   :  { %139 = vmatpush.msra.mxu2 %v547_v9  ;;  %163 = vmatpush.msra.mxu3 %v547_v9 }
  0x23   :  { %92 = vmatpush.msra.mxu0 %v553_v10  ;;  %116 = vmatpush.msra.mxu1 %v553_v10 }
  0x24   :  { %140 = vmatpush.msra.mxu2 %v553_v10  ;;  %164 = vmatpush.msra.mxu3 %v553_v10 }
  0x25   :  { %93 = vmatpush.msra.mxu0 %v559_v11  ;;  %117 = vmatpush.msra.mxu1 %v559_v11 }
  0x26   :  { %141 = vmatpush.msra.mxu2 %v559_v11  ;;  %165 = vmatpush.msra.mxu3 %v559_v11 }
  0x27   :  { %94 = vmatpush.msra.mxu0 %v565_v12  ;;  %118 = vmatpush.msra.mxu1 %v565_v12 }
  0x28   :  { %142 = vmatpush.msra.mxu2 %v565_v12  ;;  %166 = vmatpush.msra.mxu3 %v565_v12 }
  0x29   :  { %95 = vmatpush.msra.mxu0 %v571_v13  ;;  %119 = vmatpush.msra.mxu1 %v571_v13 }
  0x2a   :  { %143 = vmatpush.msra.mxu2 %v571_v13  ;;  %167 = vmatpush.msra.mxu3 %v571_v13 }
  0x2b   :  { %96 = vmatpush.msra.mxu0 %v577_v14  ;;  %120 = vmatpush.msra.mxu1 %v577_v14 }
  0x2c   :  { %144 = vmatpush.msra.mxu2 %v577_v14  ;;  %168 = vmatpush.msra.mxu3 %v577_v14 }
  0x2d   :  { %97 = vmatpush.msra.mxu0 %v583_v15  ;;  %121 = vmatpush.msra.mxu1 %v583_v15 }
  0x2e   :  { %98 = vmatmul.f32.vlgmr.msra.gmra.mxu0 %v463_v16  ;;  %145 = vmatpush.msra.mxu2 %v583_v15 }
  0x2f   :  { %169 = vmatpush.msra.mxu3 %v583_v15  ;;  %178 = vmatpush.msrb.mxu0 %v499_v0 }
  0x30   :  { %202 = vmatpush.msrb.mxu1 %v499_v0  ;;  %226 = vmatpush.msrb.mxu2 %v499_v0 }
  0x31   :  { %179 = vmatpush.msrb.mxu0 %v501_v1  ;;  %250 = vmatpush.msrb.mxu3 %v499_v0 }
  0x32   :  { %203 = vmatpush.msrb.mxu1 %v501_v1  ;;  %227 = vmatpush.msrb.mxu2 %v501_v1 }
  0x33   :  { %180 = vmatpush.msrb.mxu0 %v505_v2  ;;  %251 = vmatpush.msrb.mxu3 %v501_v1 }
  0x34   :  { %204 = vmatpush.msrb.mxu1 %v505_v2  ;;  %228 = vmatpush.msrb.mxu2 %v505_v2 }
  0x35   :  { %181 = vmatpush.msrb.mxu0 %v511_v3  ;;  %252 = vmatpush.msrb.mxu3 %v505_v2  ;;  %v339_v2 = vld [vmem:[%s668_s3] ss:$0 sm:$0xff] }
  0x36   :  { %205 = vmatpush.msrb.mxu1 %v511_v3  ;;  %229 = vmatpush.msrb.mxu2 %v511_v3 }
  0x37   :  { %182 = vmatpush.msrb.mxu0 %v517_v4  ;;  %253 = vmatpush.msrb.mxu3 %v511_v3 }
  0x38   :  { %206 = vmatpush.msrb.mxu1 %v517_v4  ;;  %230 = vmatpush.msrb.mxu2 %v517_v4 }
  0x39   :  { %183 = vmatpush.msrb.mxu0 %v523_v5  ;;  %254 = vmatpush.msrb.mxu3 %v517_v4 }
  0x3a   :  { %207 = vmatpush.msrb.mxu1 %v523_v5  ;;  %231 = vmatpush.msrb.mxu2 %v523_v5 }
  0x3b   :  { %184 = vmatpush.msrb.mxu0 %v529_v6  ;;  %255 = vmatpush.msrb.mxu3 %v523_v5 }
  0x3c   :  { %208 = vmatpush.msrb.mxu1 %v529_v6  ;;  %232 = vmatpush.msrb.mxu2 %v529_v6 }
  0x3d   :  { %185 = vmatpush.msrb.mxu0 %v535_v7  ;;  %256 = vmatpush.msrb.mxu3 %v529_v6 }
  0x3e   :  { %209 = vmatpush.msrb.mxu1 %v535_v7  ;;  %233 = vmatpush.msrb.mxu2 %v535_v7 }
  0x3f   :  { %186 = vmatpush.msrb.mxu0 %v541_v8  ;;  %257 = vmatpush.msrb.mxu3 %v535_v7 }
  0x40   :  { %210 = vmatpush.msrb.mxu1 %v541_v8  ;;  %234 = vmatpush.msrb.mxu2 %v541_v8 }
  0x41   :  { %187 = vmatpush.msrb.mxu0 %v547_v9  ;;  %258 = vmatpush.msrb.mxu3 %v541_v8 }
  0x42   :  { %211 = vmatpush.msrb.mxu1 %v547_v9  ;;  %235 = vmatpush.msrb.mxu2 %v547_v9 }
  0x43   :  { %188 = vmatpush.msrb.mxu0 %v553_v10  ;;  %259 = vmatpush.msrb.mxu3 %v547_v9 }
  0x44   :  { %212 = vmatpush.msrb.mxu1 %v553_v10  ;;  %236 = vmatpush.msrb.mxu2 %v553_v10 }
  0x45   :  { %189 = vmatpush.msrb.mxu0 %v559_v11  ;;  %260 = vmatpush.msrb.mxu3 %v553_v10 }
  0x46   :  { %213 = vmatpush.msrb.mxu1 %v559_v11  ;;  %237 = vmatpush.msrb.mxu2 %v559_v11 }
  0x47   :  { %190 = vmatpush.msrb.mxu0 %v565_v12  ;;  %261 = vmatpush.msrb.mxu3 %v559_v11 }
  0x48   :  { %214 = vmatpush.msrb.mxu1 %v565_v12  ;;  %238 = vmatpush.msrb.mxu2 %v565_v12 }
  0x49   :  { %191 = vmatpush.msrb.mxu0 %v571_v13  ;;  %262 = vmatpush.msrb.mxu3 %v565_v12 }
  0x4a   :  { %215 = vmatpush.msrb.mxu1 %v571_v13  ;;  %239 = vmatpush.msrb.mxu2 %v571_v13 }
  0x4b   :  { %192 = vmatpush.msrb.mxu0 %v577_v14  ;;  %263 = vmatpush.msrb.mxu3 %v571_v13 }
  0x4c   :  { %216 = vmatpush.msrb.mxu1 %v577_v14  ;;  %240 = vmatpush.msrb.mxu2 %v577_v14 }
  0x4d   :  { %193 = vmatpush.msrb.mxu0 %v583_v15  ;;  %264 = vmatpush.msrb.mxu3 %v577_v14 }
  0x4e   :  { %217 = vmatpush.msrb.mxu1 %v583_v15  ;;  %241 = vmatpush.msrb.mxu2 %v583_v15 }
  0x4f   :  { %265 = vmatpush.msrb.mxu3 %v583_v15  ;;  %293 = vmatpush.msra.mxu0 %v288_v41 }
  0x51   :  { %294 = vmatpush.msra.mxu0 %v287_v42 }
  0x53   :  { %295 = vmatpush.msra.mxu0 %v286_v43 }
  0x55   :  { %296 = vmatpush.msra.mxu0 %v285_v44 }
  0x57   :  { %297 = vmatpush.msra.mxu0 %v284_v45 }
  0x59   :  { %298 = vmatpush.msra.mxu0 %v283_v46 }
  0x5b   :  { %299 = vmatpush.msra.mxu0 %v282_v47 }
  0x5d   :  { %300 = vmatpush.msra.mxu0 %v281_v48 }
  0x5f   :  { %301 = vmatpush.msra.mxu0 %v280_v49 }
  0x61   :  { %302 = vmatpush.msra.mxu0 %v279_v50 }
  0x63   :  { %303 = vmatpush.msra.mxu0 %v278_v55 }
  0x65   :  { %304 = vmatpush.msra.mxu0 %v277_v56 }
  0x67   :  { %305 = vmatpush.msra.mxu0 %v276_v57 }
  0x69   :  { %306 = vmatpush.msra.mxu0 %v275_v58 }
  0x6b   :  { %307 = vmatpush.msra.mxu0 %v274_v59 }
  0x6d   :  { %308 = vmatpush.msra.mxu0 %v273_v60 }
  0xab   :  { %v99_v18 = vpop.f32.mrf.mxu0 }
  0xac   :  { %v102_v19 = vadd.f32 %v99_v18, %v81_v17 }
  0xae   :  { %340 = vtanh.f32 %v102_v19 }
  0xb4   :  { %v341_v20 = vpop.eup %340 }
  0xb5   :  { %122 = vmatmul.f32.vlgmr.msra.gmra.mxu1 %v341_v20 }
 0x132   :  { %v123_v22 = vpop.f32.mrf.mxu1 }
 0x133   :  { %v126_v23 = vadd.f32 %v123_v22, %v105_v21 }
 0x135   :  { %342 = vtanh.f32 %v126_v23 }
 0x13b   :  { %v343_v24 = vpop.eup %342 }
 0x13c   :  { %146 = vmatmul.f32.vlgmr.msra.gmra.mxu2 %v343_v24 }
 0x1bf   :  { %v147_v26 = vpop.f32.mrf.mxu2 }
 0x1c0   :  { %v150_v27 = vadd.f32 %v147_v26, %v129_v25 }
 0x1c2   :  { %344 = vtanh.f32 %v150_v27 }
 0x1c8   :  { %v345_v28 = vpop.eup %344 }
 0x1c9   :  { %170 = vmatmul.f32.vlgmr.msra.gmra.mxu3 %v345_v28 }
 0x24c   :  { %v171_v30 = vpop.f32.mrf.mxu3 }
 0x24d   :  { %v174_v31 = vadd.f32 %v171_v30, %v153_v29 }
 0x24f   :  { %346 = vtanh.f32 %v174_v31 }
 0x255   :  { %v347_v32 = vpop.eup %346 }
 0x256   :  { %194 = vmatmul.f32.vlgmr.msrb.gmra.mxu0 %v347_v32 }
 0x2d3   :  { %v195_v34 = vpop.f32.mrf.mxu0 }
 0x2d4   :  { %v198_v35 = vadd.f32 %v195_v34, %v177_v33 }
 0x2d6   :  { %348 = vtanh.f32 %v198_v35 }
 0x2dc   :  { %v349_v36 = vpop.eup %348 }
 0x2dd   :  { %218 = vmatmul.f32.vlgmr.msrb.gmra.mxu1 %v349_v36 }
 0x35a   :  { %v219_v38 = vpop.f32.mrf.mxu1 }
 0x35b   :  { %v222_v39 = vadd.f32 %v219_v38, %v201_v37 }
 0x35d   :  { %350 = vtanh.f32 %v222_v39 }
 0x363   :  { %v351_v40 = vpop.eup %350 }
 0x364   :  { %242 = vmatmul.f32.vlgmr.msrb.gmra.mxu2 %v351_v40 }
 0x3e7   :  { %v243_v52 = vpop.f32.mrf.mxu2 }
 0x3e8   :  { %v246_v53 = vadd.f32 %v243_v52, %v225_v51 }
 0x3ea   :  { %352 = vtanh.f32 %v246_v53 }
 0x3f0   :  { %v353_v54 = vpop.eup %352 }
 0x3f1   :  { %266 = vmatmul.f32.vlgmr.msrb.gmra.mxu3 %v353_v54 }
 0x474   :  { %v267_v62 = vpop.f32.mrf.mxu3 }
 0x475   :  { %v270_v63 = vadd.f32 %v267_v62, %v249_v61 }
 0x477   :  { %354 = vtanh.f32 %v270_v63 }
 0x47d   :  { %v355_v0 = vpop.eup %354 }
 0x47e   :  { %v272_v1 = vmax.f32 %v355_v0, 0.0 }
 0x480   :  { %309 = vmatmul.f32.vlgmr.msra.gmra.mxu0 %v272_v1 }
 0x4fd   :  { %v310_v3 = vpop.f32.mrf.mxu0 }
 0x4fe   :  { %v311_v4 = vadd.f32 %v339_v2, %v310_v3 }
 0x500   :  { %313 = vst [vmem:[#allocation8] sm:$0xff] %v311_v4 }
 0x501   :  { %324 = dma.vmem_to_hbm [thread:$0]  %s320_s6, 128, %s322_s9, [#allocation4]  }
 0x502   :  { %456 = dma.done.wait [#allocation4], 128  }
 0x503   :  { %457 = vsyncadd [#allocation4], 4294967168 }
 0x504   :  { %329 = vsyncpa [#allocation3], 1 }
 0x505   :  { %330 = vsyncpa [#allocation6], 1 }
 0x506   :  { %331 = vsyncpa [#allocation4], 1 }

</bundles_post_ra>
